<compile_context>
chip_gen: v6e
topology: v6e:2x2x1
jax: 0.10.0
libtpu: 0.0.40
codegen_flags: <defaults>
</compile_context>

<pallas_src>
import jax
import jax.numpy as jnp
from jax.experimental import pallas as pl
from jax.experimental.pallas import tpu as pltpu


def _mlp_kernel(x_ref, w0_ref, b0_ref, w1_ref, b1_ref, o_ref):
    # fc0 on the MXU: (TB, S) @ (S, S) + (1, S), f32 accumulation.
    h = jnp.dot(x_ref[...], w0_ref[...], preferred_element_type=jnp.float32)
    h = jnp.maximum(h + b0_ref[...], 0.0)          # bias + ReLU on the VPU
    # fc1 as a VPU multiply + lane reduction (avoids an N=1 MXU matmul):
    #   (TB, S) * (1, S) -> sum over lanes -> (TB, 1), plus scalar bias (SMEM).
    out = jnp.sum(h * w1_ref[...], axis=-1, keepdims=True) + b1_ref[0]
    o_ref[...] = out.astype(o_ref.dtype)


def _round_up(n, m):
    return ((n + m - 1) // m) * m


def net_forward(x, w0, b0, w1_row, b1, *, block_b=512):
    """Fused fc0 -> relu -> fc1.

    x      : (B, S)  float32
    w0     : (S, S)  float32   (in, out) layout
    b0     : (1, S)  float32
    w1_row : (1, S)  float32   (fc1 weight stored as a row)
    b1     : (1,)    float32   (scalar bias, placed in SMEM)
    returns  (B, 1)  float32
    """
    B, S = x.shape

    # Tile the batch: grid axis is "parallel" so a big batched call (many
    # independent Net instances stacked along B) shards across TensorCores.
    bp = _round_up(B, 8)
    tb = min(block_b, bp)
    bp = _round_up(bp, tb)
    if bp != B:
        x = jnp.pad(x, ((0, bp - B), (0, 0)))

    grid = (bp // tb,)
    out = pl.pallas_call(
        _mlp_kernel,
        out_shape=jax.ShapeDtypeStruct((bp, 1), x.dtype),
        grid=grid,
        in_specs=[
            pl.BlockSpec((tb, S), lambda i: (i, 0)),   # x tile per grid step
            pl.BlockSpec((S, S), lambda i: (0, 0)),    # w0 (resident)
            pl.BlockSpec((1, S), lambda i: (0, 0)),    # b0 row
            pl.BlockSpec((1, S), lambda i: (0, 0)),    # w1 row
            pl.BlockSpec(memory_space=pltpu.MemorySpace.SMEM),  # b1 scalar
        ],
        out_specs=pl.BlockSpec((tb, 1), lambda i: (i, 0)),
        compiler_params=pltpu.CompilerParams(
            dimension_semantics=("parallel",)),
    )(x, w0, b0, w1_row, b1)

    return out[:B]


def init_params(key, sa_size):
    """Deterministic init mirroring PyTorch nn.Linear defaults:
    U(-1/sqrt(fan_in), 1/sqrt(fan_in)) for weights and biases."""
    k0w, k0b, k1w, k1b = jax.random.split(key, 4)
    bound = 1.0 / (sa_size ** 0.5)
    # fc0: PyTorch weight is (out, in) = (S, S); store (in, out).
    w0 = jax.random.uniform(k0w, (sa_size, sa_size), jnp.float32, -bound, bound)
    b0 = jax.random.uniform(k0b, (1, sa_size), jnp.float32, -bound, bound)
    # fc1: PyTorch weight is (1, S); store as a (1, S) row (used on the VPU).
    w1_row = jax.random.uniform(k1w, (1, sa_size), jnp.float32, -bound, bound)
    b1 = jax.random.uniform(k1b, (1,), jnp.float32, -bound, bound)
    return w0, b0, w1_row, b1


if __name__ == "__main__":
    key = jax.random.PRNGKey(0)
    k_in, k_param = jax.random.split(key)

    batch = 8
    sa_size = 32

    x = jax.random.normal(k_in, (batch, sa_size), dtype=jnp.float32)
    w0, b0, w1_row, b1 = init_params(k_param, sa_size)

    out = net_forward(x, w0, b0, w1_row, b1)
    out = jax.block_until_ready(out)

    # Pure-JAX reference check.
    ref = jnp.maximum(x @ w0 + b0, 0.0) @ w1_row.T + b1
    assert out.shape == (batch, 1)
    assert jnp.allclose(out, ref, atol=1e-5, rtol=1e-5)

    print("KERNEL_OK")
</pallas_src>

<mosaic_0001>
module attributes {stable_mosaic.version = 11 : i64} {
  func.func @_mlp_kernel(%arg0: i32, %arg1: memref<8x32xf32, #tpu.memory_space<vmem>>, %arg2: memref<32x32xf32, #tpu.memory_space<vmem>>, %arg3: memref<1x32xf32, #tpu.memory_space<vmem>>, %arg4: memref<1x32xf32, #tpu.memory_space<vmem>>, %arg5: memref<1xf32, #tpu.memory_space<smem>>, %arg6: memref<8x1xf32, #tpu.memory_space<vmem>>) attributes {dimension_semantics = [#tpu.dimension_semantics<parallel>], iteration_bounds = array<i64: 1>, scalar_prefetch = 0 : i64, scratch_operands = 0 : i64, tpu.core_type = #tpu.core_type<tc>, window_params = [{transform_indices = @transform_0, window_bounds = array<i64: 8, 32>}, {pipeline_mode = #tpu.pipeline_mode<synchronous>, transform_indices = @transform_1, window_bounds = array<i64: 32, 32>}, {pipeline_mode = #tpu.pipeline_mode<synchronous>, transform_indices = @transform_2, window_bounds = array<i64: 1, 32>}, {pipeline_mode = #tpu.pipeline_mode<synchronous>, transform_indices = @transform_3, window_bounds = array<i64: 1, 32>}, {transform_indices = @transform_4, window_bounds = array<i64: 1>}, {transform_indices = @transform_5, window_bounds = array<i64: 8, 1>}]} {
    %c0 = arith.constant 0 : index
    %c0_0 = arith.constant 0 : index
    %0 = vector.load %arg1[%c0, %c0_0] : memref<8x32xf32, #tpu.memory_space<vmem>>, vector<8x32xf32>
    %c0_1 = arith.constant 0 : index
    %c0_2 = arith.constant 0 : index
    %1 = vector.load %arg2[%c0_1, %c0_2] : memref<32x32xf32, #tpu.memory_space<vmem>>, vector<32x32xf32>
    %cst = arith.constant dense<0.000000e+00> : vector<8x32xf32>
    %2 = tpu.matmul %0, %1, %cst {dimension_numbers = #tpu.dot_dimension_numbers<[1], [0], [0], [1], [0, 0, 1, 1], [], []>} : vector<8x32xf32>, vector<32x32xf32>, vector<8x32xf32> -> vector<8x32xf32>
    %c0_3 = arith.constant 0 : index
    %c0_4 = arith.constant 0 : index
    %3 = vector.load %arg3[%c0_3, %c0_4] : memref<1x32xf32, #tpu.memory_space<vmem>>, vector<1x32xf32>
    %4 = vector.broadcast %3 : vector<1x32xf32> to vector<8x32xf32>
    %5 = arith.addf %2, %4 : vector<8x32xf32>
    %cst_5 = arith.constant 0.000000e+00 : f32
    %6 = vector.broadcast %cst_5 : f32 to vector<8x32xf32>
    %7 = arith.maximumf %5, %6 : vector<8x32xf32>
    %c0_6 = arith.constant 0 : index
    %c0_7 = arith.constant 0 : index
    %8 = vector.load %arg4[%c0_6, %c0_7] : memref<1x32xf32, #tpu.memory_space<vmem>>, vector<1x32xf32>
    %9 = vector.broadcast %8 : vector<1x32xf32> to vector<8x32xf32>
    %10 = arith.mulf %7, %9 : vector<8x32xf32>
    %cst_8 = arith.constant dense<0.000000e+00> : vector<8xf32>
    %11 = vector.multi_reduction <add>, %10, %cst_8 [1] : vector<8x32xf32> to vector<8xf32>
    %12 = vector.shape_cast %11 : vector<8xf32> to vector<8x1xf32>
    %c0_9 = arith.constant 0 : index
    %13 = memref.load %arg5[%c0_9] : memref<1xf32, #tpu.memory_space<smem>>
    %14 = vector.broadcast %13 : f32 to vector<8x1xf32>
    %15 = arith.addf %12, %14 : vector<8x1xf32>
    %c0_10 = arith.constant 0 : index
    %c0_11 = arith.constant 0 : index
    %16 = vector.load %arg6[%c0_10, %c0_11] : memref<8x1xf32, #tpu.memory_space<vmem>>, vector<8x1xf32>
    tpu.vector_store %arg6[%c0_10, %c0_11], %15 {strides = array<i32>} : memref<8x1xf32, #tpu.memory_space<vmem>>, vector<8x1xf32>,
    return
  }
  func.func @transform_0(%arg0: i32) -> (i32, i32) {
    %c0_i32 = arith.constant 0 : i32
    %c0_i32_0 = arith.constant 0 : i32
    return %arg0, %c0_i32 : i32, i32
  }
  func.func @transform_1(%arg0: i32) -> (i32, i32) {
    %c0_i32 = arith.constant 0 : i32
    %c0_i32_0 = arith.constant 0 : i32
    %c0_i32_1 = arith.constant 0 : i32
    return %c0_i32, %c0_i32_0 : i32, i32
  }
  func.func @transform_2(%arg0: i32) -> (i32, i32) {
    %c0_i32 = arith.constant 0 : i32
    %c0_i32_0 = arith.constant 0 : i32
    %c0_i32_1 = arith.constant 0 : i32
    return %c0_i32, %c0_i32_0 : i32, i32
  }
  func.func @transform_3(%arg0: i32) -> (i32, i32) {
    %c0_i32 = arith.constant 0 : i32
    %c0_i32_0 = arith.constant 0 : i32
    %c0_i32_1 = arith.constant 0 : i32
    return %c0_i32, %c0_i32_0 : i32, i32
  }
  func.func @transform_4(%arg0: i32) -> i32 {
    %c0_i32 = arith.constant 0 : i32
    %c0_i32_0 = arith.constant 0 : i32
    return %c0_i32 : i32
  }
  func.func @transform_5(%arg0: i32) -> (i32, i32) {
    %c0_i32 = arith.constant 0 : i32
    %c0_i32_0 = arith.constant 0 : i32
    return %arg0, %c0_i32 : i32, i32
  }
}

</mosaic_0001>

<bundles_post_ra>
// kernel: tpu_custom_call.1
= control target key start
LH: loop header
LB: loop body
LE: loop exit
PB: predicated region body
PF: predicated region fallthrough
CT: control target
= control target key end

     0   :  { %11 = vsyncpa [#allocation4], 0  ;;  %s279_s0 = inlined_call_operand.hbm [shape: f32[8,32], index: 0, kind: input, shape index: {}]   ;;  %s280_s1 = inlined_call_operand.hbm [shape: f32[32,32], index: 1, kind: input, shape index: {}]   ;;  %s281_s2 = inlined_call_operand.vmem [shape: f32[1,32], index: 2, kind: input, shape index: {}]   ;;  %s282_s3 = inlined_call_operand.vmem [shape: f32[1,32], index: 3, kind: input, shape index: {}]   ;;  %s283_s4 = inlined_call_operand.<no memory space> [shape: f32[1], index: 4, kind: input, shape index: {}]   ;;  %s284_s5 = inlined_call_operand.vmem [shape: f32[8,1], index: 5, kind: output, shape index: {}]  }
   0x1   :  { %12 = vsyncpa [#allocation6], 0  ;;  %s225_s18 = smov [#allocation3]   ;;  %s226_s20 = smov [#allocation5]  }
   0x2   :  { %s19_s19 = sshll.u32 %s225_s18, 4  ;;  %s28_s21 = sshll.u32 %s226_s20, 4  ;;  %s20_s19 = int_to_ptr.vmem [resolvable:$true] %s19_s19  ;;  %s29_s21 = int_to_ptr.vmem [resolvable:$true] %s28_s21 }
   0x3   :  { %s189_s22 = scalar_lea.vmem %s20_s19, 128  ;;  %p194_p1 = scmp.lt.s32.totalorder %s20_s19, %s20_s19 }
   0x4   :  { %p190_p0 = scmp.ne.s32.totalorder %s20_s19, %s189_s22  ;;  %p195_p2 = scmp.lt.s32.totalorder %s189_s22, %s189_s22 }
   0x6   :  { %p196_p3 = por %p195_p2, %p194_p1 }
   0x8   :  { %p197_p4 = pnand %p196_p3, %p190_p0 }
   0xa   :  { %200 = shalt.err (!%p197_p4)
}
   0xb   :  { %22 = dma.hbm_to_vmem [thread:$0]  %s279_s0, 128, %s20_s19, [#allocation4]  }
   0xc   :  { %s209_s25 = scalar_lea.vmem %s29_s21, 512  ;;  %p214_p6 = scmp.lt.s32.totalorder %s29_s21, %s29_s21 }
   0xd   :  { %p210_p5 = scmp.ne.s32.totalorder %s29_s21, %s209_s25  ;;  %p215_p7 = scmp.lt.s32.totalorder %s209_s25, %s209_s25 }
   0xf   :  { %p216_p8 = por %p215_p7, %p214_p6 }
  0x11   :  { %p217_p9 = pnand %p216_p8, %p210_p5 }
  0x13   :  { %220 = shalt.err (!%p217_p9)
}
  0x14   :  { %s227_s26 = smov 128   ;;  %s228_s27 = smov 8  }
  0x15   :  { %34 = dma.hbm_to_vmem [thread:$0]  %s280_s1, 512, %s29_s21, [#allocation6], %s227_s26, %s227_s26, %s228_s27  }
  0x16   :  { %221 = dma.done.wait [#allocation4], 128  }
  0x17   :  { %222 = vsyncadd [#allocation4], 4294967168 }
  0x18   :  { %223 = dma.done.wait [#allocation6], 512  }
  0x19   :  { %224 = vsyncadd [#allocation6], 4294966784  ;;  %v229_v0 = vmov 0.0   ;;  %vm230_vm0 = vmmov 0   ;;  %v51_v1 = vld [vmem:[#allocation5 + $0x18] sm:$0xff]  ;;  %v50_v2 = vld [vmem:[#allocation5 + $0x10] sm:$0xff]  ;;  %v146_v14 = vstv %s283_s4 }
  0x1a   :  { %164 = vmatprep.subr.mxu0 %v229_v0  ;;  %172 = vmatprep.mubr.msk.f32.mxu0 %vm230_vm0, %v229_v0  ;;  %v49_v3 = vld [vmem:[#allocation5 + $0x8] sm:$0xff]  ;;  %v48_v4 = vld [vmem:[#allocation5] sm:$0xff]  ;;  %v47_v5 = vld [vmem:[#allocation3] sm:$0xff]  ;;  %vm59_vm1 = vcmask 261120   ;;  %vm148_vm2 = vcmask 7168  }
  0x1b   :  { %165 = vmatpush3.msra.mxu0 %v51_v1  ;;  %v156_v6 = vld [vmem:[%s281_s2] ss:$0 sm:$0xff] }
  0x1c   :  { %166 = vmatprep.subr.mxu0 %v229_v0  ;;  %v158_v10 = vld [vmem:[%s282_s3] ss:$0 sm:$0xff] }
  0x1d   :  { %167 = vmatpush3.msra.mxu0 %v50_v2 }
  0x1e   :  { %168 = vmatprep.subr.mxu0 %v229_v0 }
  0x1f   :  { %169 = vmatpush3.msra.mxu0 %v49_v3 }
  0x20   :  { %170 = vmatprep.subr.mxu0 %v229_v0 }
  0x21   :  { %171 = vmatpush3.msra.mxu0 %v48_v4 }
  0x22   :  { %173 = vmatmul.mubr.msk.f32.vlgmr.msra.gmra.mxu0 %vm59_vm1, %v47_v5 }
  0xe2   :  { %v129_v7 = vpop.f32.mrf.mxu0 }
  0xe3   :  { %v130_v8 = vadd.f32 %v156_v6, %v129_v7 }
  0xe4   :  { %v174_v9 = vpop.f32.mrf.mxu0 }
  0xe5   :  { %v133_v11 = vmax.f32 %v130_v8, 0.0 }
  0xe7   :  { %v141_v12 = vmul.f32 %v158_v10, %v133_v11 }
  0xe9   :  { %v142_v13 = vsel %vm59_vm1, %v141_v12, 0.0 }
  0xea   :  { %143 = vadd.xlane.f32.xlu0 %v142_v13 }
 0x173   :  { %v144_v15 = vpop.xlane.xlu0 %143 }
 0x174   :  { %v147_v16 = vadd.f32 %v146_v14, %v144_v15 }
 0x176   :  { %149 = vst.msk [vmem:[%s284_s5] sm:$0xff] %vm148_vm2, %v147_v16 }
 0x177   :  { %154 = vsyncpa [#allocation4], 1 }
 0x178   :  { %155 = vsyncpa [#allocation6], 1 }

</bundles_post_ra>
